<compile_context>
chip_gen: v6e
topology: v6e:2x2x1
jax: 0.10.0
libtpu: 0.0.40
codegen_flags: <defaults>
</compile_context>

<pallas_src>
import functools

import numpy as np
import jax
import jax.numpy as jnp
from jax import lax
from jax.experimental import pallas as pl
from jax.experimental.pallas import tpu as pltpu


def _round_up(x: int, m: int) -> int:
    return ((x + m - 1) // m) * m


def _vmem_budget_bytes() -> int:
    """Conservative VMEM budget for the single-block (no-grid) design."""
    try:
        return int(pltpu.get_tpu_info().vmem_capacity_bytes) // 2
    except Exception:
        # Fall back to half of the smallest generation (v7x: 64 MiB / TC).
        return 32 * 1024 * 1024


def _vmem_working_set_bytes(n: int, k: int, m_pad: int) -> int:
    # x + ids + {oh, xc, dist2, expd} temporaries + csum + a few (1, M_pad) rows.
    per_row_words = k + 128 + 4 * m_pad
    return 4 * (n * per_row_words + m_pad * k + 8 * m_pad)


def _make_magnet_kernel(n: int, m_pad: int, m_take: int, alpha: float):
    """Kernel body; n / m_pad / m_take / alpha are compile-time constants."""
    inv_n = 1.0 / float(n)
    inv_nm1 = 1.0 / (float(n) - 1.0)

    def kernel(x_ref, ids_ref, out_ref):
        x = x_ref[...]                                      # (N, K)   f32
        ids = ids_ref[...]                                  # (N, 1)   int32

        # ---- one-hot built in-kernel (lane iota vs broadcast ids), f32 only
        # for the MXU contractions.
        oh = (lax.broadcasted_iota(jnp.int32, (n, m_pad), 1) == ids
              ).astype(jnp.float32)                         # (N, M_pad)

        # ---- per-cluster sums / counts, both as MXU matmuls (a^T.b / 1-row
        # forms) so results land lane-dense with no relayout.
        csum = lax.dot_general(
            oh, x, (((0,), (0,)), ((), ())),
            preferred_element_type=jnp.float32)             # (M_pad, K)
        ones_n = jnp.ones((1, n), jnp.float32)
        counts = lax.dot_general(
            ones_n, oh, (((1,), (0,)), ((), ())),
            preferred_element_type=jnp.float32)             # (1, M_pad)
        valid = (counts > 0.0).astype(jnp.float32)
        inv_cnt = 1.0 / jnp.maximum(counts, 1.0)            # exact reciprocal

        # ---- pairwise squared distances ||x_i - mean_m||^2 without ever
        # materializing mean_m (or any transpose):
        #   dist2 = |x|^2 + |csum_m|^2 * inv_cnt^2 - 2 (x . csum_m) * inv_cnt
        x2 = jnp.sum(x * x, axis=1, keepdims=True)          # (N, 1)
        xc = lax.dot_general(
            x, csum, (((1,), (1,)), ((), ())),
            preferred_element_type=jnp.float32)             # (N, M_pad)
        ones_k = jnp.ones((1, x.shape[1]), jnp.float32)
        csq = lax.dot_general(
            ones_k, csum * csum, (((1,), (1,)), ((), ())),
            preferred_element_type=jnp.float32)             # (1, M_pad)
        dist2 = x2 + csq * inv_cnt * inv_cnt - 2.0 * xc * inv_cnt
        dist2 = jnp.maximum(dist2, 0.0)                     # kill cancellation

        # ---- variance of own-cluster distances (torch 'stdev' == -2 * var)
        own = jnp.sum(dist2 * oh, axis=1, keepdims=True)    # (N, 1)
        var = jnp.sum(own, keepdims=True) * inv_nm1         # (1, 1)
        inv_stdev = 1.0 / (-2.0 * var)                      # exact

        # ---- per-sample magnet loss in log-space:
        #   loss_i = -min(own_i/stdev - alpha - log(denom_i), 0)
        # (denom == 0 -> log = -inf -> min(+inf, 0) = 0, matching the torch
        #  clamp(max=0) of log(exp(.)/0); also removes exp-underflow.)
        expd = jnp.exp(dist2 * inv_stdev)                               # (N, M_pad)
        denom = jnp.sum(expd * (valid - oh), axis=1, keepdims=True)     # (N, 1)
        per_sample = -jnp.minimum(
            own * inv_stdev - alpha - jnp.log(denom), 0.0)              # (N, 1)

        # ---- per-cluster loss sums via a 1-column MXU matmul; total loss over
        # the first m_take clusters and the variance are folded into the two
        # tail lanes so there is one lane-dense slab / one unmasked store.
        closs = lax.dot_general(
            per_sample, oh, (((0,), (0,)), ((), ())),
            preferred_element_type=jnp.float32)             # (1, M_pad)
        lane = lax.broadcasted_iota(jnp.int32, (1, m_pad), 1)
        total = jnp.sum(jnp.where(lane < m_take, closs, 0.0),
                        keepdims=True)                      # (1, 1)

        slab = closs * inv_n                                # scaled per-cluster
        slab = jnp.where(lane == (m_pad - 2), total * inv_n, slab)
        slab = jnp.where(lane == (m_pad - 1), var, slab)
        out_ref[...] = slab

    return kernel


@functools.lru_cache(maxsize=None)
def _get_magnet_call(n: int, k: int, m_pad: int, m_take: int, alpha: float):
    """Memoized pallas_call: single whole-array block (tiny VMEM footprint)."""
    est = _vmem_working_set_bytes(n, k, m_pad)
    budget = _vmem_budget_bytes()
    assert est <= budget, (
        f"magnet_loss single-block working set ({est} B) exceeds the VMEM "
        f"budget ({budget} B); restructure to a two-pass N-tiled grid.")
    return pl.pallas_call(
        _make_magnet_kernel(n, m_pad, m_take, alpha),
        out_shape=jax.ShapeDtypeStruct((1, m_pad), jnp.float32),
        in_specs=[
            pl.BlockSpec(memory_space=pltpu.MemorySpace.VMEM),
            pl.BlockSpec(memory_space=pltpu.MemorySpace.VMEM),
        ],
        out_specs=pl.BlockSpec(memory_space=pltpu.MemorySpace.VMEM),
    )


@functools.partial(jax.jit,
                   static_argnames=("m_pad", "m_take", "alpha", "d_count"))
def _magnet_device(outputs, local_ids, cluster_ids, loss_vector, loss_count,
                   *, m_pad, m_take, alpha, d_count):
    n, k = outputs.shape
    x = outputs.astype(jnp.float32)                     # unpadded (N, K)
    ids = local_ids.reshape(n, 1).astype(jnp.int32)     # (N, 1) for the kernel

    out = _get_magnet_call(n, k, m_pad, m_take, float(alpha))(x, ids)  # (1, M_pad)
    var = out[0, m_pad - 1]
    loss = out[0, m_pad - 2].reshape(1)                 # already / num_instances
    closs_scaled = out[0, :m_take]                      # per-cluster sums / N

    inv_n = 1.0 / float(n)                              # num_instances == N
    # torch returns (loss_vector + new contributions) / num_instances
    loss_vector_new = (loss_vector * inv_n).at[cluster_ids].add(closs_scaled)
    loss_count_new = loss_count.at[cluster_ids].add(d_count)
    return loss, loss_vector_new, loss_count_new, var


def _remap_clusters(indices_np, assignment_np):
    key = (indices_np.tobytes(), assignment_np.tobytes(),
           indices_np.dtype.str, assignment_np.dtype.str,
           indices_np.shape, assignment_np.shape)
    return _remap_clusters_cached(key)


@functools.lru_cache(maxsize=32)
def _remap_clusters_cached(key):
    idx_b, asg_b, idx_dt, asg_dt, idx_shape, asg_shape = key
    indices_np = np.frombuffer(idx_b, dtype=idx_dt).reshape(idx_shape)
    assignment_np = np.frombuffer(asg_b, dtype=asg_dt).reshape(asg_shape)
    # Cluster id of each batch row; unique ids in first-appearance order
    # (matches the python-dict insertion order of the torch module).
    batch_cids = assignment_np[indices_np]
    uniq, first_pos = np.unique(batch_cids, return_index=True)
    order = np.argsort(first_pos, kind="stable")
    clusters = uniq[order]                               # appearance-ordered ids
    rank = np.argsort(order)                             # sorted pos -> rank
    local_ids = rank[np.searchsorted(uniq, batch_cids)].astype(np.int32)
    return local_ids, clusters.astype(np.int32)


def magnet_loss_forward(outputs, indices, assignment, loss_vector, loss_count,
                        images=None, model=None, D=12, M=4, alpha=7.18):
    """Mirrors magnet_loss.forward; `images` / `model` are unused (as in torch)."""
    outputs = jnp.asarray(outputs)
    indices_np = np.ascontiguousarray(np.asarray(indices))
    assignment_np = np.ascontiguousarray(np.asarray(assignment))
    local_ids, clusters = _remap_clusters(indices_np, assignment_np)

    n, k = outputs.shape
    n_clusters = int(clusters.shape[0])
    m_pad = max(128, _round_up(n_clusters + 2, 128))     # +2 tail lanes: loss, var
    m_take = min(int(M), n_clusters)
    # TODO(synk): like the torch module, assumes the batch holds >= M clusters
    # with exactly D samples each; extra samples per cluster are all summed
    # (torch only visits the first D of the first M clusters).

    loss, lv, lc, var = _magnet_device(
        outputs,
        jnp.asarray(local_ids),
        jnp.asarray(clusters[:m_take]),
        jnp.asarray(loss_vector, jnp.float32),
        jnp.asarray(loss_count, jnp.float32),
        m_pad=m_pad, m_take=m_take, alpha=float(alpha), d_count=float(D))
    return loss, lv, lc, var


if __name__ == "__main__":
    D, M, alpha = 12, 4, 7.18
    emb_dim = 32
    n = M * D  # 48 embeddings in the batch

    key = jax.random.PRNGKey(0)
    outputs = jax.random.normal(key, (n, emb_dim), dtype=jnp.float32)

    # batch layout: M clusters x D samples, mapped onto global cluster ids
    global_cluster_ids = np.array([3, 7, 1, 5], dtype=np.int32)
    indices = np.arange(n, dtype=np.int32)
    assignment = np.repeat(global_cluster_ids, D)   # assignment[index] -> cluster id

    num_total_clusters = 10
    loss_vector = jnp.zeros((num_total_clusters,), jnp.float32)
    loss_count = jnp.zeros((num_total_clusters,), jnp.float32)

    loss, lv, lc, var = magnet_loss_forward(
        outputs, indices, assignment, loss_vector, loss_count,
        images=None, model=None, D=D, M=M, alpha=alpha)

    jax.block_until_ready((loss, lv, lc, var))
    assert np.isfinite(float(loss[0])) and np.isfinite(float(var))
    print("KERNEL_OK")
</pallas_src>

<mosaic_0001>
module attributes {stable_mosaic.version = 11 : i64} {
  func.func @kernel(%arg0: memref<48x32xf32, #tpu.memory_space<vmem>>, %arg1: memref<48x1xi32, #tpu.memory_space<vmem>>, %arg2: memref<1x128xf32, #tpu.memory_space<vmem>>) attributes {dimension_semantics = [], scalar_prefetch = 0 : i64, scratch_operands = 0 : i64, tpu.core_type = #tpu.core_type<tc>} {
    %c0 = arith.constant 0 : index
    %c0_0 = arith.constant 0 : index
    %0 = vector.load %arg0[%c0, %c0_0] : memref<48x32xf32, #tpu.memory_space<vmem>>, vector<48x32xf32>
    %c0_1 = arith.constant 0 : index
    %c0_2 = arith.constant 0 : index
    %1 = vector.load %arg1[%c0_1, %c0_2] : memref<48x1xi32, #tpu.memory_space<vmem>>, vector<48x1xi32>
    %2 = tpu.iota {dimensions = array<i32: 1>} : vector<48x128xi32>
    %3 = vector.broadcast %1 : vector<48x1xi32> to vector<48x128xi32>
    %4 = arith.cmpi eq, %2, %3 : vector<48x128xi32>
    %5 = arith.extui %4 : vector<48x128xi1> to vector<48x128xi32>
    %6 = arith.sitofp %5 : vector<48x128xi32> to vector<48x128xf32>
    %cst = arith.constant dense<0.000000e+00> : vector<128x32xf32>
    %7 = tpu.matmul %6, %0, %cst {dimension_numbers = #tpu.dot_dimension_numbers<[0], [0], [1], [1], [0, 1, 1, 1], [], []>} : vector<48x128xf32>, vector<48x32xf32>, vector<128x32xf32> -> vector<128x32xf32>
    %cst_3 = arith.constant 1.000000e+00 : f32
    %8 = vector.broadcast %cst_3 : f32 to vector<1x48xf32>
    %cst_4 = arith.constant dense<0.000000e+00> : vector<1x128xf32>
    %9 = tpu.matmul %8, %6, %cst_4 {dimension_numbers = #tpu.dot_dimension_numbers<[1], [0], [0], [1], [0, 0, 1, 1], [], []>} : vector<1x48xf32>, vector<48x128xf32>, vector<1x128xf32> -> vector<1x128xf32>
    %cst_5 = arith.constant 0.000000e+00 : f32
    %10 = vector.broadcast %cst_5 : f32 to vector<1x128xf32>
    %11 = arith.cmpf ogt, %9, %10 : vector<1x128xf32>
    %12 = arith.extui %11 : vector<1x128xi1> to vector<1x128xi32>
    %13 = arith.sitofp %12 : vector<1x128xi32> to vector<1x128xf32>
    %cst_6 = arith.constant 1.000000e+00 : f32
    %14 = vector.broadcast %cst_6 : f32 to vector<1x128xf32>
    %15 = arith.maximumf %9, %14 : vector<1x128xf32>
    %cst_7 = arith.constant 1.000000e+00 : f32
    %16 = vector.broadcast %cst_7 : f32 to vector<1x128xf32>
    %17 = arith.divf %16, %15 : vector<1x128xf32>
    %18 = arith.mulf %0, %0 : vector<48x32xf32>
    %cst_8 = arith.constant dense<0.000000e+00> : vector<48xf32>
    %19 = vector.multi_reduction <add>, %18, %cst_8 [1] : vector<48x32xf32> to vector<48xf32>
    %20 = vector.shape_cast %19 : vector<48xf32> to vector<48x1xf32>
    %cst_9 = arith.constant dense<0.000000e+00> : vector<48x128xf32>
    %21 = tpu.matmul %0, %7, %cst_9 {dimension_numbers = #tpu.dot_dimension_numbers<[1], [1], [0], [0], [0, 0, 1, 0], [], []>} : vector<48x32xf32>, vector<128x32xf32>, vector<48x128xf32> -> vector<48x128xf32>
    %cst_10 = arith.constant 1.000000e+00 : f32
    %22 = vector.broadcast %cst_10 : f32 to vector<1x32xf32>
    %23 = arith.mulf %7, %7 : vector<128x32xf32>
    %cst_11 = arith.constant dense<0.000000e+00> : vector<1x128xf32>
    %24 = tpu.matmul %22, %23, %cst_11 {dimension_numbers = #tpu.dot_dimension_numbers<[1], [1], [0], [0], [0, 0, 1, 0], [], []>} : vector<1x32xf32>, vector<128x32xf32>, vector<1x128xf32> -> vector<1x128xf32>
    %25 = arith.mulf %24, %17 : vector<1x128xf32>
    %26 = arith.mulf %25, %17 : vector<1x128xf32>
    %27 = vector.broadcast %20 : vector<48x1xf32> to vector<48x128xf32>
    %28 = vector.broadcast %26 : vector<1x128xf32> to vector<48x128xf32>
    %29 = arith.addf %27, %28 : vector<48x128xf32>
    %cst_12 = arith.constant 2.000000e+00 : f32
    %30 = vector.broadcast %cst_12 : f32 to vector<48x128xf32>
    %31 = arith.mulf %30, %21 : vector<48x128xf32>
    %32 = vector.broadcast %17 : vector<1x128xf32> to vector<48x128xf32>
    %33 = arith.mulf %31, %32 : vector<48x128xf32>
    %34 = arith.subf %29, %33 : vector<48x128xf32>
    %cst_13 = arith.constant 0.000000e+00 : f32
    %35 = vector.broadcast %cst_13 : f32 to vector<48x128xf32>
    %36 = arith.maximumf %34, %35 : vector<48x128xf32>
    %37 = arith.mulf %36, %6 : vector<48x128xf32>
    %cst_14 = arith.constant dense<0.000000e+00> : vector<48xf32>
    %38 = vector.multi_reduction <add>, %37, %cst_14 [1] : vector<48x128xf32> to vector<48xf32>
    %39 = vector.shape_cast %38 : vector<48xf32> to vector<48x1xf32>
    %40 = vector.shape_cast %39 : vector<48x1xf32> to vector<1x48x1xf32>
    %cst_15 = arith.constant dense<0.000000e+00> : vector<1xf32>
    %41 = vector.multi_reduction <add>, %40, %cst_15 [1, 2] : vector<1x48x1xf32> to vector<1xf32>
    %42 = vector.shape_cast %41 : vector<1xf32> to vector<1x1x1xf32>
    %43 = vector.extract %42[0, 0, 0] : f32 from vector<1x1x1xf32>
    %44 = vector.broadcast %43 : f32 to vector<1x1xf32>
    %cst_16 = arith.constant 0.0212765951 : f32
    %45 = vector.broadcast %cst_16 : f32 to vector<1x1xf32>
    %46 = arith.mulf %44, %45 : vector<1x1xf32>
    %cst_17 = arith.constant -2.000000e+00 : f32
    %47 = vector.broadcast %cst_17 : f32 to vector<1x1xf32>
    %48 = arith.mulf %47, %46 : vector<1x1xf32>
    %cst_18 = arith.constant 1.000000e+00 : f32
    %49 = vector.broadcast %cst_18 : f32 to vector<1x1xf32>
    %50 = arith.divf %49, %48 : vector<1x1xf32>
    %51 = vector.broadcast %50 : vector<1x1xf32> to vector<48x128xf32>
    %52 = arith.mulf %36, %51 : vector<48x128xf32>
    %53 = math.exp %52 : vector<48x128xf32>
    %54 = vector.broadcast %13 : vector<1x128xf32> to vector<48x128xf32>
    %55 = arith.subf %54, %6 : vector<48x128xf32>
    %56 = arith.mulf %53, %55 : vector<48x128xf32>
    %cst_19 = arith.constant dense<0.000000e+00> : vector<48xf32>
    %57 = vector.multi_reduction <add>, %56, %cst_19 [1] : vector<48x128xf32> to vector<48xf32>
    %58 = vector.shape_cast %57 : vector<48xf32> to vector<48x1xf32>
    %59 = vector.broadcast %50 : vector<1x1xf32> to vector<48x1xf32>
    %60 = arith.mulf %39, %59 : vector<48x1xf32>
    %cst_20 = arith.constant 7.180000e+00 : f32
    %61 = vector.broadcast %cst_20 : f32 to vector<48x1xf32>
    %62 = arith.subf %60, %61 : vector<48x1xf32>
    %63 = math.log %58 : vector<48x1xf32>
    %64 = arith.subf %62, %63 : vector<48x1xf32>
    %cst_21 = arith.constant 0.000000e+00 : f32
    %65 = vector.broadcast %cst_21 : f32 to vector<48x1xf32>
    %66 = arith.minimumf %64, %65 : vector<48x1xf32>
    %cst_22 = arith.constant 0.000000e+00 : f32
    %67 = vector.broadcast %cst_22 : f32 to vector<48x1xf32>
    %68 = arith.subf %67, %66 : vector<48x1xf32>
    %cst_23 = arith.constant dense<0.000000e+00> : vector<1x128xf32>
    %69 = tpu.matmul %68, %6, %cst_23 {dimension_numbers = #tpu.dot_dimension_numbers<[0], [0], [1], [1], [0, 1, 1, 1], [], []>} : vector<48x1xf32>, vector<48x128xf32>, vector<1x128xf32> -> vector<1x128xf32>
    %70 = tpu.iota {dimensions = array<i32: 1>} : vector<1x128xi32>
    %c4_i32 = arith.constant 4 : i32
    %71 = vector.broadcast %c4_i32 : i32 to vector<1x128xi32>
    %72 = arith.cmpi slt, %70, %71 : vector<1x128xi32>
    %cst_24 = arith.constant 0.000000e+00 : f32
    %73 = vector.broadcast %cst_24 : f32 to vector<1x128xf32>
    %74 = arith.select %72, %69, %73 : vector<1x128xi1>, vector<1x128xf32>
    %75 = vector.shape_cast %74 : vector<1x128xf32> to vector<1x1x128xf32>
    %cst_25 = arith.constant dense<0.000000e+00> : vector<1xf32>
    %76 = vector.multi_reduction <add>, %75, %cst_25 [1, 2] : vector<1x1x128xf32> to vector<1xf32>
    %77 = vector.shape_cast %76 : vector<1xf32> to vector<1x1x1xf32>
    %78 = vector.extract %77[0, 0, 0] : f32 from vector<1x1x1xf32>
    %79 = vector.broadcast %78 : f32 to vector<1x1xf32>
    %cst_26 = arith.constant 0.020833334 : f32
    %80 = vector.broadcast %cst_26 : f32 to vector<1x128xf32>
    %81 = arith.mulf %69, %80 : vector<1x128xf32>
    %c126_i32 = arith.constant 126 : i32
    %82 = vector.broadcast %c126_i32 : i32 to vector<1x128xi32>
    %83 = arith.cmpi eq, %70, %82 : vector<1x128xi32>
    %cst_27 = arith.constant 0.020833334 : f32
    %84 = vector.broadcast %cst_27 : f32 to vector<1x1xf32>
    %85 = arith.mulf %79, %84 : vector<1x1xf32>
    %86 = vector.shape_cast %85 : vector<1x1xf32> to vector<1x1xf32>
    %87 = vector.broadcast %86 : vector<1x1xf32> to vector<1x128xf32>
    %88 = arith.select %83, %87, %81 : vector<1x128xi1>, vector<1x128xf32>
    %c127_i32 = arith.constant 127 : i32
    %89 = vector.broadcast %c127_i32 : i32 to vector<1x128xi32>
    %90 = arith.cmpi eq, %70, %89 : vector<1x128xi32>
    %91 = vector.shape_cast %46 : vector<1x1xf32> to vector<1x1xf32>
    %92 = vector.broadcast %91 : vector<1x1xf32> to vector<1x128xf32>
    %93 = arith.select %90, %92, %88 : vector<1x128xi1>, vector<1x128xf32>
    %c0_28 = arith.constant 0 : index
    %c0_29 = arith.constant 0 : index
    %94 = vector.load %arg2[%c0_28, %c0_29] : memref<1x128xf32, #tpu.memory_space<vmem>>, vector<1x128xf32>
    tpu.vector_store %arg2[%c0_28, %c0_29], %93 {strides = array<i32>} : memref<1x128xf32, #tpu.memory_space<vmem>>, vector<1x128xf32>,
    return
  }
}

</mosaic_0001>

<bundles_post_ra>
// kernel: _magnet_device.1
= control target key start
LH: loop header
LB: loop body
LE: loop exit
PB: predicated region body
PF: predicated region fallthrough
CT: control target
= control target key end

     0   :  { %v1327_v0 = vmov 0   ;;  %v1328_v5 = vmov 0.0   ;;  %vm1329_vm0 = vmmov 0   ;;  %v23_v12 = vlaneseq  ;;  %s1767_s1 = inlined_call_operand.vmem [shape: s32[48,1], index: 1, kind: input, shape index: {}]   ;;  %s1768_s0 = inlined_call_operand.vmem [shape: f32[48,32], index: 0, kind: input, shape index: {}]   ;;  %s1769_s2 = inlined_call_operand.vmem [shape: f32[1,128], index: 2, kind: output, shape index: {}]  }
   0x1   :  { %1298 = vset.pattern.permute.xlu1 %v1327_v0  ;;  %1297 = vset.pattern.permute.xlu0 %v1327_v0  ;;  %v19_v1 = vld [vmem:[%s1767_s1 + $0x10] sm:$0xff]  ;;  %v17_v2 = vld [vmem:[%s1767_s1] sm:$0xff]  ;;  %v20_v3 = vld [vmem:[%s1767_s1 + $0x18] sm:$0xff]  ;;  %v1330_v25 = vmov 1.0   ;;  %vm93_vm7 = vcmask 392192   ;;  %vm372_vm8 = vcmask 261120  }
   0x2   :  { %32 = vperm.xlu1 %1298, %v19_v1   ;;  %26 = vperm.xlu0 %1297, %v17_v2   ;;  %v18_v4 = vld [vmem:[%s1767_s1 + $0x8] sm:$0xff]  ;;  %v21_v7 = vld [vmem:[%s1767_s1 + $0x20] sm:$0xff]  ;;  %v1382_v10 = vld [vmem:[%s1768_s0 + $0x18] sm:$0xff]  ;;  %v1396_v13 = vand.u32 127, %v23_v12  ;;  %vm746_vm9 = vcmask 7168   ;;  %vm967_vm12 = vcmask 1040384  }
   0x3   :  { %1183 = vmatprep.subr.mxu1 %v1328_v5  ;;  %v22_v6 = vld [vmem:[%s1767_s1 + $0x28] sm:$0xff]  ;;  %1195 = vmatprep.mubr.msk.f32.mxu1 %vm1329_vm0, %v1328_v5  ;;  %v1375_v9 = vld [vmem:[%s1768_s0 + $0x20] sm:$0xff]  ;;  %v1389_v11 = vld [vmem:[%s1768_s0 + $0x10] sm:$0xff]  ;;  %v369_v55 = vmul.f32 %v1382_v10, %v1382_v10 }
   0x4   :  { %v1370_v8 = vld [vmem:[%s1768_s0 + $0x28] sm:$0xff]  ;;  %v1411_v17 = vld [vmem:[%s1768_s0] sm:$0xff]  ;;  %v368_v53 = vmul.f32 %v1389_v11, %v1389_v11  ;;  %v370_v58 = vmul.f32 %v1375_v9, %v1375_v9  ;;  %vm965_vm11 = vcmp.lt.s32.totalorder %v1396_v13, 4  ;;  %vm980_vm13 = vcmp.eq.s32.totalorder %v1396_v13, 126 }
   0x5   :  { %1147 = vmatprep.subr.mxu0 %v1370_v8  ;;  %v1401_v14 = vld [vmem:[%s1768_s0 + $0x8] sm:$0xff]  ;;  %v366_v47 = vmul.f32 %v1411_v17, %v1411_v17  ;;  %v371_v49 = vmul.f32 %v1370_v8, %v1370_v8  ;;  %v382_v57 = vsel %vm372_vm8, %v369_v55, 0.0  ;;  %vm983_vm14 = vcmp.eq.s32.totalorder %v1396_v13, 127 }
   0x6   :  { %35 = vperm.xlu1 %1298, %v20_v3   ;;  %29 = vperm.xlu0 %1297, %v18_v4   ;;  %v367_v48 = vmul.f32 %v1401_v14, %v1401_v14  ;;  %v379_v54 = vsel %vm372_vm8, %v368_v53, 0.0  ;;  %v385_v61 = vsel %vm372_vm8, %v370_v58, 0.0 }
   0x7   :  { %1148 = vmatpush3.msra.mxu0 %v1370_v8  ;;  %v373_v50 = vsel %vm372_vm8, %v366_v47, 0.0  ;;  %v388_v51 = vsel %vm372_vm8, %v371_v49, 0.0 }
   0x8   :  { %1149 = vmatprep.subr.mxu0 %v1375_v9  ;;  %v376_v52 = vsel %vm372_vm8, %v367_v48, 0.0 }
   0x9   :  { %1150 = vmatpush3.msra.mxu0 %v1375_v9 }
   0xa   :  { %41 = vperm.xlu1 %1298, %v22_v6   ;;  %38 = vperm.xlu0 %1297, %v21_v7  }
   0xb   :  { %1151 = vmatprep.subr.mxu0 %v1382_v10 }
   0xc   :  { %1152 = vmatpush3.msra.mxu0 %v1382_v10 }
   0xd   :  { %1153 = vmatprep.subr.mxu0 %v1389_v11 }
   0xe   :  { %1154 = vmatpush3.msra.mxu0 %v1389_v11 }
   0xf   :  { %1155 = vmatprep.subr.mxu0 %v1401_v14 }
  0x10   :  { %1156 = vmatpush3.msra.mxu0 %v1401_v14 }
  0x11   :  { %1157 = vmatprep.subr.mxu0 %v1411_v17 }
  0x12   :  { %1158 = vmatpush3.msra.mxu0 %v1411_v17 }
  0x2e   :  { %374 = vadd.xlane.f32.xlu1 %v373_v50 }
  0x32   :  { %377 = vadd.xlane.f32.xlu1 %v376_v52 }
  0x36   :  { %380 = vadd.xlane.f32.xlu1 %v379_v54 }
  0x3a   :  { %383 = vadd.xlane.f32.xlu1 %v382_v57 }
  0x3e   :  { %386 = vadd.xlane.f32.xlu1 %v385_v61 }
  0x7d   :  { %v1403_v15 = vpop.permute.xlu1 %32  ;;  %v1405_v16 = vpop.permute.xlu0 %26 }
  0x7e   :  { %vm43_vm1 = vcmp.eq.s32.totalorder %v1396_v13, %v1405_v16  ;;  %vm45_vm2 = vcmp.eq.s32.totalorder %v1396_v13, %v1403_v15 }
  0x7f   :  { %v1420_v18 = vsel %vm43_vm1, 1.0, %v1328_v5  ;;  %v1444_v22 = vsel %vm45_vm2, 1.0, %v1328_v5 }
  0x80   :  { %61 = vxpose.xlu0.b32.start [1/6] (short) %v1420_v18, 128 }
  0x81   :  { %v1425_v19 = vpop.permute.xlu1 %35  ;;  %v1427_v20 = vpop.permute.xlu0 %29 }
  0x82   :  { %vm44_vm3 = vcmp.eq.s32.totalorder %v1396_v13, %v1427_v20  ;;  %vm46_vm5 = vcmp.eq.s32.totalorder %v1396_v13, %v1425_v19 }
  0x83   :  { %v1437_v21 = vsel %vm44_vm3, 1.0, %v1328_v5  ;;  %v1471_v26 = vsel %vm46_vm5, 1.0, %v1328_v5 }
  0x84   :  { %62 = vxpose.xlu0.b32.cont [2/6] (short) %v1437_v21, 128 }
  0x85   :  { %v1446_v23 = vpop.permute.xlu1 %41  ;;  %v1448_v24 = vpop.permute.xlu0 %38 }
  0x86   :  { %vm48_vm4 = vcmp.eq.s32.totalorder %v1396_v13, %v1446_v23  ;;  %vm47_vm6 = vcmp.eq.s32.totalorder %v1396_v13, %v1448_v24 }
  0x87   :  { %1184 = vmatpush3.msk.msra.mxu1 %vm48_vm4, %v1330_v25  ;;  %v1488_v27 = vsel %vm47_vm6, 1.0, %v1328_v5  ;;  %v1507_v28 = vsel %vm48_vm4, 1.0, %v1328_v5 }
  0x88   :  { %1185 = vmatprep.subr.mxu1 %v1328_v5  ;;  %63 = vxpose.xlu0.b32.cont [3/6] (short) %v1444_v22, 128 }
  0x89   :  { %1186 = vmatpush3.msk.msra.mxu1 %vm47_vm6, %v1330_v25 }
  0x8a   :  { %1187 = vmatprep.subr.mxu1 %v1328_v5 }
  0x8b   :  { %1188 = vmatpush3.msk.msra.mxu1 %vm46_vm5, %v1330_v25 }
  0x8c   :  { %64 = vxpose.xlu0.b32.cont [4/6] (short) %v1471_v26, 128  ;;  %1189 = vmatprep.subr.mxu1 %v1328_v5 }
  0x8d   :  { %1190 = vmatpush3.msk.msra.mxu1 %vm45_vm2, %v1330_v25 }
  0x8e   :  { %1191 = vmatprep.subr.mxu1 %v1328_v5 }
  0x8f   :  { %1192 = vmatpush3.msk.msra.mxu1 %vm44_vm3, %v1330_v25 }
  0x90   :  { %1193 = vmatprep.subr.mxu1 %v1328_v5  ;;  %65 = vxpose.xlu0.b32.cont [5/6] (short) %v1488_v27, 128 }
  0x91   :  { %1194 = vmatpush3.msk.msra.mxu1 %vm43_vm1, %v1330_v25 }
  0x92   :  { %1196 = vmatmul.mubr.msk.f32.vlgmr.msra.gmra.mxu1 %vm93_vm7, %v1330_v25  ;;  %1239 = vmatprep.subr.mxu1 %v1328_v5 }
  0x93   :  { %1271 = vmatprep.mubr.msk.f32.mxu1 %vm1329_vm0, %v1328_v5 }
  0x94   :  { %66 = vxpose.xlu0.b32.end [6/6] (short) %v1507_v28, 128 }
  0xe9   :  { %389 = vadd.xlane.f32.xlu0 %v388_v51 }
  0xfc   :  { %v77_v29 = vpop.trf.xlu0 }
  0xfd   :  { %1159 = vmatprep.mubr.msk.f32.mxu0 %vm93_vm7, %v77_v29 }
 0x100   :  { %v78_v30 = vpop.trf.xlu0 }
 0x101   :  { %1160 = vmatmul.mubr.msk.f32.vlgmr.msra.gmra.mxu0 %vm93_vm7, %v78_v30 }
 0x104   :  { %v79_v31 = vpop.trf.xlu0 }
 0x105   :  { %1162 = vmatprep.mubr.msk.f32.mxu0 %vm93_vm7, %v79_v31 }
 0x108   :  { %v80_v32 = vpop.trf.xlu0 }
 0x109   :  { %1163 = vmatmul.mubr.msk.f32.gmra.mxu0 %vm93_vm7, %v80_v32 }
 0x10c   :  { %v81_v33 = vpop.trf.xlu0 }
 0x10d   :  { %1165 = vmatprep.mubr.msk.f32.mxu0 %vm93_vm7, %v81_v33 }
 0x110   :  { %v82_v34 = vpop.trf.xlu0 }
 0x111   :  { %1166 = vmatmul.mubr.msk.f32.gmra.mxu0 %vm93_vm7, %v82_v34 }
 0x114   :  { %v83_v35 = vpop.trf.xlu0 }
 0x115   :  { %1168 = vmatprep.mubr.msk.f32.mxu0 %vm93_vm7, %v83_v35 }
 0x118   :  { %v84_v36 = vpop.trf.xlu0 }
 0x119   :  { %1169 = vmatmul.mubr.msk.f32.gmra.mxu0 %vm93_vm7, %v84_v36 }
 0x11c   :  { %v85_v37 = vpop.trf.xlu0 }
 0x11d   :  { %1171 = vmatprep.mubr.msk.f32.mxu0 %vm93_vm7, %v85_v37 }
 0x120   :  { %v86_v38 = vpop.trf.xlu0 }
 0x121   :  { %1172 = vmatmul.mubr.msk.f32.gmra.mxu0 %vm93_vm7, %v86_v38 }
 0x124   :  { %v87_v39 = vpop.trf.xlu0 }
 0x125   :  { %1174 = vmatprep.mubr.msk.f32.mxu0 %vm93_vm7, %v87_v39 }
 0x128   :  { %v88_v40 = vpop.trf.xlu0 }
 0x129   :  { %1175 = vmatmul.mubr.msk.f32.gmra.mxu0 %vm93_vm7, %v88_v40 }
 0x12c   :  { %v89_v41 = vpop.trf.xlu0 }
 0x12d   :  { %1177 = vmatprep.mubr.msk.f32.mxu0 %vm93_vm7, %v89_v41 }
 0x130   :  { %v90_v42 = vpop.trf.xlu0 }
 0x131   :  { %1178 = vmatmul.mubr.msk.f32.gmra.mxu0 %vm93_vm7, %v90_v42 }
 0x134   :  { %v91_v43 = vpop.trf.xlu0 }
 0x135   :  { %1180 = vmatprep.mubr.msk.f32.mxu0 %vm93_vm7, %v91_v43 }
 0x138   :  { %v92_v44 = vpop.trf.xlu0 }
 0x139   :  { %1181 = vmatmul.mubr.msk.f32.gmra.mxu0 %vm93_vm7, %v92_v44 }
 0x13a   :  { %1230 = vmatprep.mubr.msk.f32.mxu0 %vm372_vm8, %v1411_v17 }
 0x152   :  { %v1528_v45 = vpop.f32.mrf.mxu1 }
 0x153   :  { %vm360_vm10 = vcmp.gt.f32.partialorder %v1528_v45, 0.0 }
 0x154   :  { %v1197_v46 = vpop.f32.mrf.mxu1 }
 0x1c1   :  { %v1546_v56 = vpop.f32.mrf.mxu0 }
 0x1c2   :  { %v553_v47 = vmul.f32 %v1546_v56, %v1546_v56 }
 0x1c3   :  { %v1551_v59 = vpop.f32.mrf.mxu0 }
 0x1c4   :  { %v552_v48 = vmul.f32 %v1551_v59, %v1551_v59 }
 0x1c9   :  { %v1553_v60 = vpop.f32.mrf.mxu0 }
 0x1ca   :  { %v555_v44 = vmul.f32 %v1553_v60, %v1553_v60 }
 0x1cb   :  { %v1556_v62 = vpop.f32.mrf.mxu0 }
 0x1cc   :  { %v554_v46 = vmul.f32 %v1556_v62, %v1556_v62 }
 0x1d1   :  { %v1558_v63 = vpop.f32.mrf.mxu0 }
 0x1d2   :  { %v557_v42 = vmul.f32 %v1558_v63, %v1558_v63 }
 0x1d3   :  { %v1560_v0 = vpop.f32.mrf.mxu0 }
 0x1d4   :  { %v556_v43 = vmul.f32 %v1560_v0, %v1560_v0 }
 0x1d9   :  { %v1170_v1 = vpop.f32.mrf.mxu0 }
 0x1da   :  { %v559_v40 = vmul.f32 %v1170_v1, %v1170_v1 }
 0x1db   :  { %v238_v2 = vpop.f32.mrf.mxu0 }
 0x1dc   :  { %v558_v41 = vmul.f32 %v238_v2, %v238_v2 }
 0x1e1   :  { %v1173_v3 = vpop.f32.mrf.mxu0 }
 0x1e2   :  { %v561_v38 = vmul.f32 %v1173_v3, %v1173_v3 }
 0x1e3   :  { %v248_v4 = vpop.f32.mrf.mxu0 }
 0x1e4   :  { %v560_v39 = vmul.f32 %v248_v4, %v248_v4 }
 0x1e9   :  { %v1176_v6 = vpop.f32.mrf.mxu0 }
 0x1ea   :  { %v563_v36 = vmul.f32 %v1176_v6, %v1176_v6 }
 0x1eb   :  { %v258_v7 = vpop.f32.mrf.mxu0 }
 0x1ec   :  { %v562_v37 = vmul.f32 %v258_v7, %v258_v7 }
 0x1f1   :  { %v1179_v17 = vpop.f32.mrf.mxu0 }
 0x1f2   :  { %v565_v34 = vmul.f32 %v1179_v17, %v1179_v17 }
 0x1f3   :  { %v268_v29 = vpop.f32.mrf.mxu0 }
 0x1f4   :  { %v564_v35 = vmul.f32 %v268_v29, %v268_v29 }
 0x1f9   :  { %v1182_v30 = vpop.f32.mrf.mxu0 }
 0x1fa   :  { %v567_v31 = vmul.f32 %v1182_v30, %v1182_v30  ;;  %1198 = vmatprep.subr.msk.mxu0 %vm372_vm8, %v1182_v30 }
 0x1fb   :  { %v278_v32 = vpop.f32.mrf.mxu0  ;;  %1199 = vmatpush3.xpose.msk.msra.mxu0 %vm372_vm8, %v1182_v30 }
 0x1fc   :  { %1200 = vmatprep.subr.msk.mxu0 %vm372_vm8, %v278_v32  ;;  %1240 = vmatpush3.xpose.msk.msra.mxu1 %vm372_vm8, %v567_v31  ;;  %v566_v33 = vmul.f32 %v278_v32, %v278_v32 }
 0x1fd   :  { %1241 = vmatprep.subr.mxu1 %v1328_v5 }
 0x1ff   :  { %1201 = vmatpush3.xpose.msk.msra.mxu0 %vm372_vm8, %v278_v32 }
 0x200   :  { %1202 = vmatprep.subr.msk.mxu0 %vm372_vm8, %v1179_v17  ;;  %1242 = vmatpush3.xpose.msk.msra.mxu1 %vm372_vm8, %v566_v33 }
 0x201   :  { %1243 = vmatprep.subr.mxu1 %v1328_v5 }
 0x203   :  { %1203 = vmatpush3.xpose.msk.msra.mxu0 %vm372_vm8, %v1179_v17 }
 0x204   :  { %1204 = vmatprep.subr.msk.mxu0 %vm372_vm8, %v268_v29  ;;  %1244 = vmatpush3.xpose.msk.msra.mxu1 %vm372_vm8, %v565_v34 }
 0x205   :  { %1245 = vmatprep.subr.mxu1 %v1328_v5 }
 0x207   :  { %1205 = vmatpush3.xpose.msk.msra.mxu0 %vm372_vm8, %v268_v29 }
 0x208   :  { %1206 = vmatprep.subr.msk.mxu0 %vm372_vm8, %v1176_v6  ;;  %1246 = vmatpush3.xpose.msk.msra.mxu1 %vm372_vm8, %v564_v35 }
 0x209   :  { %1247 = vmatprep.subr.mxu1 %v1328_v5 }
 0x20b   :  { %1207 = vmatpush3.xpose.msk.msra.mxu0 %vm372_vm8, %v1176_v6 }
 0x20c   :  { %1208 = vmatprep.subr.msk.mxu0 %vm372_vm8, %v258_v7  ;;  %1248 = vmatpush3.xpose.msk.msra.mxu1 %vm372_vm8, %v563_v36 }
 0x20d   :  { %1249 = vmatprep.subr.mxu1 %v1328_v5 }
 0x20f   :  { %1209 = vmatpush3.xpose.msk.msra.mxu0 %vm372_vm8, %v258_v7 }
 0x210   :  { %1210 = vmatprep.subr.msk.mxu0 %vm372_vm8, %v1173_v3  ;;  %1250 = vmatpush3.xpose.msk.msra.mxu1 %vm372_vm8, %v562_v37 }
 0x211   :  { %1251 = vmatprep.subr.mxu1 %v1328_v5 }
 0x213   :  { %1211 = vmatpush3.xpose.msk.msra.mxu0 %vm372_vm8, %v1173_v3 }
 0x214   :  { %1212 = vmatprep.subr.msk.mxu0 %vm372_vm8, %v248_v4  ;;  %1252 = vmatpush3.xpose.msk.msra.mxu1 %vm372_vm8, %v561_v38 }
 0x215   :  { %1253 = vmatprep.subr.mxu1 %v1328_v5 }
 0x217   :  { %1213 = vmatpush3.xpose.msk.msra.mxu0 %vm372_vm8, %v248_v4 }
 0x218   :  { %1214 = vmatprep.subr.msk.mxu0 %vm372_vm8, %v1170_v1  ;;  %1254 = vmatpush3.xpose.msk.msra.mxu1 %vm372_vm8, %v560_v39  ;;  %v390_v39 = vpop.xlane.xlu0 %389 }
 0x219   :  { %1255 = vmatprep.subr.mxu1 %v1328_v5 }
 0x21b   :  { %1215 = vmatpush3.xpose.msk.msra.mxu0 %vm372_vm8, %v1170_v1 }
 0x21c   :  { %1216 = vmatprep.subr.msk.mxu0 %vm372_vm8, %v238_v2  ;;  %1256 = vmatpush3.xpose.msk.msra.mxu1 %vm372_vm8, %v559_v40 }
 0x21d   :  { %1257 = vmatprep.subr.mxu1 %v1328_v5 }
 0x21f   :  { %1217 = vmatpush3.xpose.msk.msra.mxu0 %vm372_vm8, %v238_v2 }
 0x220   :  { %1218 = vmatprep.subr.msk.mxu0 %vm372_vm8, %v1558_v63  ;;  %1258 = vmatpush3.xpose.msk.msra.mxu1 %vm372_vm8, %v558_v41 }
 0x221   :  { %1259 = vmatprep.subr.mxu1 %v1328_v5 }
 0x223   :  { %1219 = vmatpush3.xpose.msk.msra.mxu0 %vm372_vm8, %v1558_v63 }
 0x224   :  { %1220 = vmatprep.subr.msk.mxu0 %vm372_vm8, %v1560_v0  ;;  %1260 = vmatpush3.xpose.msk.msra.mxu1 %vm372_vm8, %v557_v42 }
 0x225   :  { %1261 = vmatprep.subr.mxu1 %v1328_v5 }
 0x227   :  { %1221 = vmatpush3.xpose.msk.msra.mxu0 %vm372_vm8, %v1560_v0 }
 0x228   :  { %1222 = vmatprep.subr.msk.mxu0 %vm372_vm8, %v1553_v60  ;;  %1262 = vmatpush3.xpose.msk.msra.mxu1 %vm372_vm8, %v556_v43 }
 0x229   :  { %1263 = vmatprep.subr.mxu1 %v1328_v5 }
 0x22b   :  { %1223 = vmatpush3.xpose.msk.msra.mxu0 %vm372_vm8, %v1553_v60 }
 0x22c   :  { %1224 = vmatprep.subr.msk.mxu0 %vm372_vm8, %v1556_v62  ;;  %1264 = vmatpush3.xpose.msk.msra.mxu1 %vm372_vm8, %v555_v44 }
 0x22d   :  { %1265 = vmatprep.subr.mxu1 %v1328_v5 }
 0x22f   :  { %1225 = vmatpush3.xpose.msk.msra.mxu0 %vm372_vm8, %v1556_v62 }
 0x230   :  { %1226 = vmatprep.subr.msk.mxu0 %vm372_vm8, %v1546_v56  ;;  %1266 = vmatpush3.xpose.msk.msra.mxu1 %vm372_vm8, %v554_v46 }
 0x231   :  { %1267 = vmatprep.subr.mxu1 %v1328_v5 }
 0x233   :  { %1227 = vmatpush3.xpose.msk.msra.mxu0 %vm372_vm8, %v1546_v56 }
 0x234   :  { %1228 = vmatprep.subr.msk.mxu0 %vm372_vm8, %v1551_v59  ;;  %1268 = vmatpush3.xpose.msk.msra.mxu1 %vm372_vm8, %v553_v47 }
 0x235   :  { %1269 = vmatprep.subr.mxu1 %v1328_v5 }
 0x237   :  { %1229 = vmatpush3.xpose.msk.msra.mxu0 %vm372_vm8, %v1551_v59 }
 0x238   :  { %1270 = vmatpush3.xpose.msk.msra.mxu1 %vm372_vm8, %v552_v48  ;;  %1274 = vmatprep.subr.mxu0 %v1328_v5 }
 0x23a   :  { %1231 = vmatmul.mubr.msk.f32.vlgmr.msra.gmra.mxu0 %vm372_vm8, %v1401_v14 }
 0x23b   :  { %1272 = vmatmul.mubr.msk.f32.vlgmr.msra.gmra.mxu1 %vm372_vm8, %v1330_v25  ;;  %1275 = vmatpush3.msk.msra.mxu0 %vm48_vm4, %v1330_v25 }
 0x23c   :  { %1276 = vmatprep.subr.mxu0 %v1328_v5  ;;  %1233 = vmatprep.mubr.msk.f32.mxu0 %vm372_vm8, %v1389_v11  ;;  %v691_v11 = vshrl.u32 %v23_v12, 7 }
 0x23d   :  { %1277 = vmatpush3.msk.msra.mxu0 %vm47_vm6, %v1330_v25 }
 0x23e   :  { %1234 = vmatmul.mubr.msk.f32.gmra.mxu0 %vm372_vm8, %v1382_v10  ;;  %1278 = vmatprep.subr.mxu0 %v1328_v5  ;;  %v1695_v50 = vsub.s32 0, %v691_v11 }
 0x23f   :  { %1279 = vmatpush3.msk.msra.mxu0 %vm46_vm5, %v1330_v25  ;;  %1236 = vmatprep.mubr.msk.f32.mxu0 %vm372_vm8, %v1375_v9  ;;  %v363_v9 = vmax.f32 %v1528_v45, 1.0 }
 0x240   :  { %1280 = vmatprep.subr.mxu0 %v1328_v5 }
 0x241   :  { %1281 = vmatpush3.msk.msra.mxu0 %vm45_vm2, %v1330_v25  ;;  %1299 = vrcp.f32 %v363_v9 }
 0x242   :  { %1237 = vmatmul.mubr.msk.f32.gmra.mxu0 %vm372_vm8, %v1370_v8  ;;  %1282 = vmatprep.subr.mxu0 %v1328_v5  ;;  %v375_v8 = vpop.xlane.xlu1 %374 }
 0x243   :  { %1283 = vmatpush3.msk.msra.mxu0 %vm44_vm3, %v1330_v25  ;;  %1286 = vmatprep.mubr.msk.f32.mxu0 %vm1329_vm0, %v1328_v5 }
 0x244   :  { %1284 = vmatprep.subr.mxu0 %v1328_v5 }
 0x245   :  { %1285 = vmatpush3.msk.msra.mxu0 %vm43_vm1, %v1330_v25 }
 0x246   :  { %v378_v10 = vpop.xlane.xlu1 %377 }
 0x24a   :  { %v381_v24 = vpop.xlane.xlu1 %380 }
 0x24e   :  { %v1300_v15 = vpop.eup %1299  ;;  %v384_v60 = vpop.xlane.xlu1 %383 }
 0x24f   :  { %v709_v53 = vrot.slane %v1300_v15, %v1695_v50 }
 0x252   :  { %v387_v32 = vpop.xlane.xlu1 %386 }
 0x2fa   :  { %v1232_v14 = vpop.f32.mrf.mxu0 }
 0x2fb   :  { %v684_v19 = vpop.f32.mrf.mxu1  ;;  %v701_v25 = vmul.f32 2.0, %v1232_v14 }
 0x2fc   :  { %v688_v20 = vmul.f32 %v1300_v15, %v684_v19  ;;  %v523_v23 = vpop.f32.mrf.mxu0 }
 0x2fd   :  { %v1273_v49 = vpop.f32.mrf.mxu1  ;;  %v700_v52 = vmul.f32 2.0, %v523_v23  ;;  %v711_v59 = vmul.f32 %v709_v53, %v701_v25 }
 0x2fe   :  { %v689_v51 = vmul.f32 %v1300_v15, %v688_v20  ;;  %v1235_v16 = vpop.f32.mrf.mxu0 }
 0x2ff   :  { %v703_v55 = vmul.f32 2.0, %v1235_v16  ;;  %v710_v12 = vmul.f32 %v709_v53, %v700_v52 }
 0x300   :  { %v693_v54 = vrot.slane %v689_v51, %v1695_v50  ;;  %v533_v56 = vpop.f32.mrf.mxu0 }
 0x301   :  { %v702_v61 = vmul.f32 2.0, %v533_v56  ;;  %v713_v0 = vmul.f32 %v709_v53, %v703_v55 }
 0x302   :  { %v1238_v57 = vpop.f32.mrf.mxu0  ;;  %v694_v58 = vadd.f32 %v693_v54, %v375_v8  ;;  %v695_v62 = vadd.f32 %v693_v54, %v378_v10  ;;  %v697_v63 = vadd.f32 %v693_v54, %v384_v60  ;;  %v696_v7 = vadd.f32 %v693_v54, %v381_v24 }
 0x303   :  { %v712_v6 = vmul.f32 %v709_v53, %v702_v61  ;;  %v705_v33 = vmul.f32 2.0, %v1238_v57  ;;  %v698_v38 = vadd.f32 %v693_v54, %v387_v32  ;;  %v699_v44 = vadd.f32 %v693_v54, %v390_v39 }
 0x304   :  { %v716_v1 = vsub.f32 %v694_v58, %v710_v12  ;;  %v543_v2 = vpop.f32.mrf.mxu0  ;;  %v717_v3 = vsub.f32 %v695_v62, %v711_v59  ;;  %v719_v31 = vsub.f32 %v697_v63, %v713_v0 }
 0x305   :  { %v704_v17 = vmul.f32 2.0, %v543_v2  ;;  %v718_v37 = vsub.f32 %v696_v7, %v712_v6  ;;  %v715_v40 = vmul.f32 %v709_v53, %v705_v33 }
 0x306   :  { %v1699_v4 = vmax.f32 %v716_v1, 0.0  ;;  %v723_v30 = vmax.f32 %v717_v3, 0.0  ;;  %v725_v36 = vmax.f32 %v719_v31, 0.0 }
 0x307   :  { %v714_v34 = vmul.f32 %v709_v53, %v704_v17  ;;  %v724_v42 = vmax.f32 %v718_v37, 0.0  ;;  %v721_v48 = vsub.f32 %v699_v44, %v715_v40 }
 0x308   :  { %v728_v29 = vmul.f32 %v1420_v18, %v1699_v4  ;;  %v729_v35 = vmul.f32 %v1437_v21, %v723_v30  ;;  %v731_v41 = vmul.f32 %v1471_v26, %v725_v36 }
 0x309   :  { %v720_v43 = vsub.f32 %v698_v38, %v714_v34  ;;  %v730_v46 = vmul.f32 %v1444_v22, %v724_v42  ;;  %v727_v8 = vmax.f32 %v721_v48, 0.0  ;;  %v1019_v34 = vsel %vm360_vm10, 1.0, %v1328_v5 }
 0x30a   :  { %734 = vadd.xlane.f32.xlu1 %v728_v29 }
 0x30b   :  { %v726_v47 = vmax.f32 %v720_v43, 0.0  ;;  %v733_v10 = vmul.f32 %v1507_v28, %v727_v8 }
 0x30d   :  { %v732_v9 = vmul.f32 %v1488_v27, %v726_v47 }
 0x30e   :  { %736 = vadd.xlane.f32.xlu1 %v729_v35 }
 0x312   :  { %740 = vadd.xlane.f32.xlu1 %v731_v41 }
 0x316   :  { %738 = vadd.xlane.f32.xlu1 %v730_v46 }
 0x31a   :  { %742 = vadd.xlane.f32.xlu1 %v732_v9 }
 0x31e   :  { %744 = vadd.xlane.f32.xlu1 %v733_v10 }
 0x393   :  { %v1708_v11 = vpop.xlane.xlu1 %734 }
 0x394   :  { %v747_v20 = vsel %vm746_vm9, %v1708_v11, 0.0 }
 0x397   :  { %v1710_v14 = vpop.xlane.xlu1 %736 }
 0x398   :  { %v748_v19 = vsel %vm746_vm9, %v1710_v14, 0.0 }
 0x399   :  { %v749_v23 = vadd.f32 %v748_v19, %v747_v20 }
 0x39b   :  { %v1712_v15 = vpop.xlane.xlu1 %740 }
 0x39c   :  { %v752_v52 = vsel %vm746_vm9, %v1712_v15, 0.0 }
 0x39f   :  { %v1716_v24 = vpop.xlane.xlu1 %738 }
 0x3a0   :  { %v750_v49 = vsel %vm746_vm9, %v1716_v24, 0.0 }
 0x3a1   :  { %v751_v51 = vadd.f32 %v750_v49, %v749_v23 }
 0x3a3   :  { %v753_v16 = vadd.f32 %v752_v52, %v751_v51  ;;  %v1720_v25 = vpop.xlane.xlu1 %742 }
 0x3a4   :  { %v754_v53 = vsel %vm746_vm9, %v1720_v25, 0.0 }
 0x3a5   :  { %v755_v54 = vadd.f32 %v754_v53, %v753_v16 }
 0x3a7   :  { %v1723_v55 = vpop.xlane.xlu1 %744 }
 0x3a8   :  { %v756_v56 = vsel %vm746_vm9, %v1723_v55, 0.0 }
 0x3a9   :  { %v757_v12 = vadd.f32 %v756_v56, %v755_v54 }
 0x3ab   :  { %758 = vadd.xlane.f32.xlu1 %v757_v12 }
 0x434   :  { %v759_v57 = vpop.xlane.xlu1 %758 }
 0x435   :  { %v760_v58 = vrot.slane %v759_v57, 4 }
 0x437   :  { %v761_v59 = vadd.f32 %v760_v58, %v759_v57 }
 0x439   :  { %v762_v60 = vrot.slane %v761_v59, 2 }
 0x43b   :  { %v763_v61 = vadd.f32 %v762_v60, %v761_v59 }
 0x43d   :  { %v764_v62 = vrot.slane %v763_v61, 1 }
 0x43f   :  { %v765_v63 = vadd.f32 %v764_v62, %v763_v61 }
 0x441   :  { %1289 = vpush %v765_v63 }
 0x472   :  { %s1290_s0 = spop %1289 }
 0x473   :  { %v767_v0 = vstv %s1290_s0 }
 0x474   :  { %v1726_v1 = vmul.f32 0.021276595, %v767_v0 }
 0x476   :  { %v769_v2 = vmul.f32 -2.0, %v1726_v1 }
 0x478   :  { %1301 = vrcp.f32 %v769_v2 }
 0x485   :  { %v1729_v3 = vpop.eup %1301 }
 0x486   :  { %v772_v6 = vmul.f32 %v1729_v3, %v1699_v4  ;;  %v773_v7 = vmul.f32 %v1729_v3, %v723_v30  ;;  %v774_v31 = vmul.f32 %v1729_v3, %v724_v42  ;;  %v775_v33 = vmul.f32 %v1729_v3, %v725_v36 }
 0x487   :  { %v776_v37 = vmul.f32 %v1729_v3, %v726_v47  ;;  %v793_v4 = vrot.slane %v1019_v34, %v1695_v50  ;;  %v777_v38 = vmul.f32 %v1729_v3, %v727_v8  ;;  %v819_v52 = vmul.f32 %v1729_v3, %v1710_v14 }
 0x488   :  { %v778_v17 = vmul.f32 1.442695, %v772_v6  ;;  %v780_v29 = vmul.f32 1.442695, %v773_v7  ;;  %v782_v32 = vmul.f32 1.442695, %v774_v31  ;;  %v820_v57 = vmul.f32 %v1729_v3, %v1716_v24 }
 0x489   :  { %v784_v35 = vmul.f32 1.442695, %v775_v33  ;;  %v786_v30 = vmul.f32 1.442695, %v776_v37  ;;  %v794_v39 = vsub.f32 %v793_v4, %v1420_v18  ;;  %v788_v41 = vmul.f32 1.442695, %v777_v38 }
 0x48a   :  { %1303 = vpow2.f32 %v778_v17  ;;  %v795_v5 = vsub.f32 %v793_v4, %v1437_v21  ;;  %v796_v50 = vsub.f32 %v793_v4, %v1444_v22  ;;  %v797_v47 = vsub.f32 %v793_v4, %v1471_v26 }
 0x48b   :  { %1305 = vpow2.f32 %v780_v29  ;;  %v798_v9 = vsub.f32 %v793_v4, %v1488_v27  ;;  %v799_v21 = vsub.f32 %v793_v4, %v1507_v28  ;;  %v818_v26 = vmul.f32 %v1729_v3, %v1708_v11 }
 0x48c   :  { %1307 = vpow2.f32 %v782_v32  ;;  %v1060_v56 = vadd.f32 -7.18, %v819_v52  ;;  %v1061_v63 = vadd.f32 -7.18, %v820_v57  ;;  %v821_v14 = vmul.f32 %v1729_v3, %v1712_v15 }
 0x48d   :  { %1309 = vpow2.f32 %v784_v35  ;;  %v1059_v16 = vadd.f32 -7.18, %v818_v26  ;;  %v822_v24 = vmul.f32 %v1729_v3, %v1720_v25  ;;  %v823_v15 = vmul.f32 %v1729_v3, %v1723_v55 }
 0x48e   :  { %1311 = vpow2.f32 %v786_v30  ;;  %v1062_v29 = vadd.f32 -7.18, %v821_v14 }
 0x48f   :  { %1313 = vpow2.f32 %v788_v41  ;;  %v1063_v37 = vadd.f32 -7.18, %v822_v24 }
 0x497   :  { %v1304_v40 = vpop.eup %1303 }
 0x498   :  { %v800_v45 = vmul.f32 %v1304_v40, %v794_v39  ;;  %v1306_v42 = vpop.eup %1305 }
 0x499   :  { %v801_v36 = vmul.f32 %v1306_v42, %v795_v5  ;;  %v1308_v43 = vpop.eup %1307 }
 0x49a   :  { %806 = vadd.xlane.f32.xlu1 %v800_v45  ;;  %v802_v44 = vmul.f32 %v1308_v43, %v796_v50  ;;  %v1310_v46 = vpop.eup %1309  ;;  %v1064_v45 = vadd.f32 -7.18, %v823_v15 }
 0x49b   :  { %v803_v18 = vmul.f32 %v1310_v46, %v797_v47  ;;  %v1312_v48 = vpop.eup %1311 }
 0x49c   :  { %v804_v8 = vmul.f32 %v1312_v48, %v798_v9  ;;  %v1314_v10 = vpop.eup %1313 }
 0x49d   :  { %v805_v19 = vmul.f32 %v1314_v10, %v799_v21 }
 0x49e   :  { %808 = vadd.xlane.f32.xlu1 %v801_v36 }
 0x4a2   :  { %810 = vadd.xlane.f32.xlu1 %v802_v44 }
 0x4a6   :  { %812 = vadd.xlane.f32.xlu1 %v803_v18 }
 0x4aa   :  { %814 = vadd.xlane.f32.xlu1 %v804_v8 }
 0x4ae   :  { %816 = vadd.xlane.f32.xlu1 %v805_v19 }
 0x523   :  { %v807_v20 = vpop.xlane.xlu1 %806 }
 0x524   :  { %1315 = vlog2.f32 %v807_v20 }
 0x527   :  { %v809_v22 = vpop.xlane.xlu1 %808 }
 0x528   :  { %1317 = vlog2.f32 %v809_v22 }
 0x52b   :  { %v811_v23 = vpop.xlane.xlu1 %810 }
 0x52c   :  { %1319 = vlog2.f32 %v811_v23 }
 0x52f   :  { %v813_v49 = vpop.xlane.xlu1 %812 }
 0x530   :  { %1321 = vlog2.f32 %v813_v49 }
 0x531   :  { %v1316_v51 = vpop.eup %1315 }
 0x532   :  { %v831_v27 = vmul.f32 0.6931472, %v1316_v51 }
 0x533   :  { %v815_v28 = vpop.xlane.xlu1 %814 }
 0x534   :  { %1323 = vlog2.f32 %v815_v28  ;;  %v842_v53 = vsub.f32 %v1059_v16, %v831_v27 }
 0x535   :  { %v1318_v54 = vpop.eup %1317 }
 0x536   :  { %v833_v12 = vmul.f32 0.6931472, %v1318_v54  ;;  %v848_v58 = vmin.f32 %v842_v53, 0.0 }
 0x537   :  { %v817_v59 = vpop.xlane.xlu1 %816 }
 0x538   :  { %v843_v11 = vsub.f32 %v1060_v56, %v833_v12  ;;  %1325 = vlog2.f32 %v817_v59  ;;  %v854_v60 = vsub.f32 0.0, %v848_v58 }
 0x539   :  { %v1320_v61 = vpop.eup %1319 }
 0x53a   :  { %v849_v62 = vmin.f32 %v843_v11, 0.0  ;;  %v835_v0 = vmul.f32 0.6931472, %v1320_v61  ;;  %860 = vxpose.xlu1.b32.start [1/6] (short) (narrow) %v854_v60, 8 }
 0x53c   :  { %v855_v2 = vsub.f32 0.0, %v849_v62  ;;  %v844_v6 = vsub.f32 %v1061_v63, %v835_v0 }
 0x53d   :  { %v1322_v7 = vpop.eup %1321 }
 0x53e   :  { %v850_v17 = vmin.f32 %v844_v6, 0.0  ;;  %v837_v31 = vmul.f32 0.6931472, %v1322_v7  ;;  %861 = vxpose.xlu1.b32.cont [2/6] (short) (narrow) %v855_v2, 8 }
 0x540   :  { %v856_v32 = vsub.f32 0.0, %v850_v17  ;;  %v845_v33 = vsub.f32 %v1062_v29, %v837_v31 }
 0x541   :  { %v1324_v34 = vpop.eup %1323 }
 0x542   :  { %v851_v35 = vmin.f32 %v845_v33, 0.0  ;;  %v839_v4 = vmul.f32 0.6931472, %v1324_v34  ;;  %862 = vxpose.xlu1.b32.cont [3/6] (short) (narrow) %v856_v32, 8 }
 0x544   :  { %v857_v30 = vsub.f32 0.0, %v851_v35  ;;  %v846_v38 = vsub.f32 %v1063_v37, %v839_v4 }
 0x545   :  { %v1326_v39 = vpop.eup %1325 }
 0x546   :  { %v852_v40 = vmin.f32 %v846_v38, 0.0  ;;  %v841_v41 = vmul.f32 0.6931472, %v1326_v39  ;;  %863 = vxpose.xlu1.b32.cont [4/6] (short) (narrow) %v857_v30, 8 }
 0x548   :  { %v858_v42 = vsub.f32 0.0, %v852_v40  ;;  %v847_v25 = vsub.f32 %v1064_v45, %v841_v41 }
 0x54a   :  { %v853_v5 = vmin.f32 %v847_v25, 0.0  ;;  %864 = vxpose.xlu1.b32.cont [5/6] (short) (narrow) %v858_v42, 8 }
 0x54c   :  { %v859_v36 = vsub.f32 0.0, %v853_v5 }
 0x54e   :  { %865 = vxpose.xlu1.b32.end [6/6] (short) (narrow) %v859_v36, 8 }
 0x5b6   :  { %v876_v43 = vpop.trf.xlu1 }
 0x5b7   :  { %1287 = vmatmul.mubr.msk.f32.vlgmr.msra.gmra.mxu0 %vm93_vm7, %v876_v43 }
 0x677   :  { %v961_v55 = vpop.f32.mrf.mxu0 }
 0x678   :  { %v966_v3 = vsel %vm965_vm11, %v961_v55, 0.0  ;;  %v979_v19 = vmul.f32 0.020833334, %v961_v55 }
 0x679   :  { %v1288_v50 = vpop.f32.mrf.mxu0  ;;  %v968_v44 = vsel %vm967_vm12, %v966_v3, 0.0 }
 0x67a   :  { %969 = vadd.xlane.f32.xlu0 %v968_v44 }
 0x703   :  { %v970_v46 = vpop.xlane.xlu0 %969 }
 0x704   :  { %v971_v47 = vrot.slane %v970_v46, 4 }
 0x706   :  { %v972_v18 = vadd.f32 %v971_v47, %v970_v46 }
 0x708   :  { %v973_v48 = vrot.slane %v972_v18, 2 }
 0x70a   :  { %v974_v9 = vadd.f32 %v973_v48, %v972_v18 }
 0x70c   :  { %v975_v8 = vrot.slane %v974_v9, 1 }
 0x70e   :  { %v976_v10 = vadd.f32 %v975_v8, %v974_v9 }
 0x710   :  { %1291 = vpush %v976_v10 }
 0x741   :  { %s1292_s4 = spop %1291 }
 0x742   :  { %v978_v21 = vstv %s1292_s4 }
 0x743   :  { %v981_v20 = vmul.f32 0.020833334, %v978_v21 }
 0x745   :  { %v982_v22 = vsel %vm980_vm13, %v981_v20, %v979_v19 }
 0x746   :  { %v984_v23 = vsel %vm983_vm14, %v1726_v1, %v982_v22 }
 0x747   :  { %985 = vst [vmem:[%s1769_s2] sm:$0x1] %v984_v23 }

</bundles_post_ra>
